<compile_context>
chip_gen: v6e
topology: v6e:2x2x1
jax: 0.10.0
libtpu: 0.0.40
codegen_flags: <defaults>
</compile_context>

<pallas_src>
import functools

import jax
import jax.numpy as jnp
from jax.experimental import pallas as pl
from jax.experimental.pallas import tpu as pltpu


def _round_up(a: int, b: int) -> int:
    return (a + b - 1) // b * b


def _sublane(dtype) -> int:
    # minimal second-to-last tile granule per dtype width
    return {4: 8, 2: 16, 1: 32}.get(jnp.dtype(dtype).itemsize, 8)


def _pick_tk(K: int, tk_max: int = 1024):
    """Largest multiple of 128 that divides round_up(K, 128) and is <= tk_max."""
    kp128 = _round_up(max(K, 1), 128)
    units = kp128 // 128
    best = 1
    for d in range(1, units + 1):
        if units % d == 0 and d * 128 <= tk_max:
            best = d
    return best * 128, kp128


def prepare_linear_params(weight, bias=None, *, tk_max: int = 1024):
    """One-time (init-time) prep of torch-layout params.

    weight: (N, K) = (out_features, in_features)  ->  returns (Kp, Np) lane-dense RHS
    bias:   (N,) or None                          ->  returns (1, Np) row

    Doing the transpose + pad here (outside the jitted hot path) removes the
    per-call full-weight HBM read+write that dominated small-batch Linear.
    """
    N, K = weight.shape
    tk, kp = _pick_tk(K, tk_max)          # kp is a multiple of tk (and of 128)
    np_ = _round_up(N, 128)
    wt = jnp.pad(weight.T, ((0, kp - K), (0, np_ - N)))      # zeros are inert
    if bias is None:
        bias = jnp.zeros((N,), dtype=weight.dtype)
    b2d = jnp.pad(bias, (0, np_ - N)).reshape(1, np_)
    return wt, b2d


def _linear_kernel_f32(x_ref, w_ref, b_ref, o_ref):
    """f32 output: accumulate straight into the VMEM-resident output block."""
    k = pl.program_id(2)

    @pl.when(k == 0)
    def _():
        o_ref[...] = jnp.broadcast_to(b_ref[...].astype(o_ref.dtype), o_ref.shape)

    o_ref[...] += jnp.dot(x_ref[...], w_ref[...], preferred_element_type=jnp.float32)


def _linear_kernel_acc(x_ref, w_ref, b_ref, o_ref, acc_ref):
    """Low-precision output: f32 VMEM accumulator, single cast/store at last k."""
    k = pl.program_id(2)

    @pl.when(k == 0)
    def _():
        acc_ref[...] = jnp.broadcast_to(b_ref[...].astype(jnp.float32), acc_ref.shape)

    acc_ref[...] += jnp.dot(x_ref[...], w_ref[...], preferred_element_type=jnp.float32)

    @pl.when(k == pl.num_programs(2) - 1)
    def _():
        o_ref[...] = acc_ref[...].astype(o_ref.dtype)


@functools.partial(
    jax.jit, static_argnames=("out_features", "tm_max", "tn_max", "tk_max")
)
def linear(x, wt_kn, bias2d, out_features, *, tm_max=512, tn_max=512, tk_max=1024):
    """y = x @ W^T + b with W^T pre-supplied as `wt_kn` (from prepare_linear_params).

    x:       (M, K)
    wt_kn:   (Kp, Np)  pre-transposed, K/N pre-padded weight
    bias2d:  (1, Np)
    returns  (M, out_features)
    """
    M, K = x.shape
    Kp, Np = wt_kn.shape
    N = out_features
    assert Np >= N and bias2d.shape == (1, Np)

    tk, kp_check = _pick_tk(K, tk_max)
    assert kp_check == Kp, "weight was prepared for a different K / tk_max"

    out_dtype = x.dtype
    sub = _sublane(x.dtype)

    tm = min(_round_up(tm_max, sub), _round_up(M, sub))
    tn = min(_round_up(tn_max, 128), Np)

    # v7x shards the "parallel" grid axes over 2 TensorCores: make sure there
    # are >= 2 parallel tiles whenever N allows it (tn stays a 256-multiple).
    if pl.cdiv(M, tm) * pl.cdiv(N, tn) < 2 and N > 256:
        tn = 256

    # Generation-aware VMEM budget: 75% of physical VMEM (v7x: 64 MiB -> 48 MiB,
    # v5e/v6e: 128 MiB -> 96 MiB) leaves headroom for Mosaic internal scratch.
    try:
        phys_vmem = pltpu.get_tpu_info().vmem_capacity_bytes
    except Exception:  # pragma: no cover - conservative fallback
        phys_vmem = 64 << 20
    budget = (phys_vmem * 3) // 4

    xi = jnp.dtype(x.dtype).itemsize
    wi = jnp.dtype(wt_kn.dtype).itemsize
    bi = jnp.dtype(bias2d.dtype).itemsize
    oi = jnp.dtype(out_dtype).itemsize
    use_scratch = out_dtype != jnp.float32

    def working_set(tm_, tn_):
        ws = 2 * (tm_ * tk * xi + tk * tn_ * wi + tn_ * bi + tm_ * tn_ * oi)
        if use_scratch:
            ws += tm_ * tn_ * 4
        return ws

    if working_set(tm, tn) > budget:  # never triggers at the defaults (~10 MiB)
        tn = min(tn, 256)
        tm = min(tm, _round_up(256, sub))

    vmem_limit = int(min(budget, max(2 * working_set(tm, tn), 32 << 20)))

    # Pad ONLY the contraction axis of the activation (required for a correct
    # accumulation); partial M / N edge blocks are handled by Pallas masking.
    xp = x if Kp == K else jnp.pad(x, ((0, 0), (0, Kp - K)))

    grid = (pl.cdiv(M, tm), pl.cdiv(N, tn), Kp // tk)

    cost = pl.CostEstimate(
        flops=2 * M * N * K,
        transcendentals=0,
        bytes_accessed=M * K * xi + Kp * Np * wi + Np * bi + M * N * oi,
    )

    kernel = _linear_kernel_acc if use_scratch else _linear_kernel_f32
    scratch = [pltpu.VMEM((tm, tn), jnp.float32)] if use_scratch else []

    # TODO(synk): if profiling on v5e shows exposed weight DMA, add
    # pipeline_mode=pl.Buffered(3) to the weight BlockSpec.
    return pl.pallas_call(
        kernel,
        out_shape=jax.ShapeDtypeStruct((M, N), out_dtype),
        grid_spec=pltpu.PrefetchScalarGridSpec(
            num_scalar_prefetch=0,
            grid=grid,
            in_specs=[
                pl.BlockSpec((tm, tk), lambda i, j, k: (i, k)),   # x tile
                pl.BlockSpec((tk, tn), lambda i, j, k: (k, j)),   # (K, N) weight tile
                pl.BlockSpec((1, tn), lambda i, j, k: (0, j)),    # bias row tile
            ],
            out_specs=pl.BlockSpec((tm, tn), lambda i, j, k: (i, j)),
            scratch_shapes=scratch,
        ),
        compiler_params=pltpu.CompilerParams(
            dimension_semantics=("parallel", "parallel", "arbitrary"),
            vmem_limit_bytes=vmem_limit,
        ),
        cost_estimate=cost,
    )(xp, wt_kn, bias2d)


if __name__ == "__main__":
    key = jax.random.PRNGKey(0)
    kx, kw, kb = jax.random.split(key, 3)

    # --- small case matching the original module usage -----------------------
    batch, in_features, out_features = 8, 32, 32
    x = jax.random.normal(kx, (batch, in_features), dtype=jnp.float32)
    weight = jax.random.normal(kw, (out_features, in_features), dtype=jnp.float32) * 0.1
    bias = jax.random.normal(kb, (out_features,), dtype=jnp.float32) * 0.1

    wt_kn, b2d = prepare_linear_params(weight, bias)          # once, at init
    y = jax.block_until_ready(linear(x, wt_kn, b2d, out_features=out_features))
    y_ref = jnp.dot(x, weight.T, precision=jax.lax.Precision.HIGHEST) + bias
    assert y.shape == (batch, out_features)
    assert jnp.allclose(y, y_ref, atol=1e-4, rtol=1e-4), "mismatch vs reference (small)"

    # --- larger case: 2 parallel N tiles + full-depth K ----------------------
    k2 = jax.random.PRNGKey(1)
    k2x, k2w, k2b = jax.random.split(k2, 3)
    M2, K2, N2 = 64, 1024, 512
    x2 = jax.random.normal(k2x, (M2, K2), dtype=jnp.float32) * 0.1
    w2 = jax.random.normal(k2w, (N2, K2), dtype=jnp.float32) * 0.05
    b2 = jax.random.normal(k2b, (N2,), dtype=jnp.float32) * 0.1

    wt2, b2d2 = prepare_linear_params(w2, b2)
    y2 = jax.block_until_ready(linear(x2, wt2, b2d2, out_features=N2))
    y2_ref = jnp.dot(x2, w2.T, precision=jax.lax.Precision.HIGHEST) + b2
    assert y2.shape == (M2, N2)
    assert jnp.allclose(y2, y2_ref, atol=1e-3, rtol=1e-3), "mismatch vs reference (tiled)"

    print("KERNEL_OK")
</pallas_src>

<mosaic_0001>
module attributes {stable_mosaic.version = 11 : i64} {
  func.func @_linear_kernel_f32(%arg0: i32, %arg1: i32, %arg2: i32, %arg3: memref<8x128xf32, #tpu.memory_space<vmem>>, %arg4: memref<128x128xf32, #tpu.memory_space<vmem>>, %arg5: memref<1x128xf32, #tpu.memory_space<vmem>>, %arg6: memref<8x128xf32, #tpu.memory_space<vmem>>) attributes {dimension_semantics = [#tpu.dimension_semantics<parallel>, #tpu.dimension_semantics<parallel>, #tpu.dimension_semantics<arbitrary>], iteration_bounds = array<i64: 1, 1, 1>, scalar_prefetch = 0 : i64, scratch_operands = 0 : i64, tpu.core_type = #tpu.core_type<tc>, window_params = [{transform_indices = @transform_0, window_bounds = array<i64: 8, 128>}, {transform_indices = @transform_1, window_bounds = array<i64: 128, 128>}, {transform_indices = @transform_2, window_bounds = array<i64: 1, 128>}, {transform_indices = @transform_3, window_bounds = array<i64: 8, 128>}]} {
    %c0_i32 = arith.constant 0 : i32
    %0 = arith.cmpi eq, %arg2, %c0_i32 : i32
    %1 = arith.extui %0 : i1 to i32
    %c0_i32_0 = arith.constant 0 : i32
    %2 = arith.cmpi ne, %1, %c0_i32_0 : i32
    scf.if %2 {
      %c0_8 = arith.constant 0 : index
      %c0_9 = arith.constant 0 : index
      %9 = vector.load %arg5[%c0_8, %c0_9] : memref<1x128xf32, #tpu.memory_space<vmem>>, vector<1x128xf32>
      %10 = vector.shape_cast %9 : vector<1x128xf32> to vector<1x128xf32>
      %11 = vector.broadcast %10 : vector<1x128xf32> to vector<8x128xf32>
      %c0_10 = arith.constant 0 : index
      %c0_11 = arith.constant 0 : index
      %12 = vector.load %arg6[%c0_10, %c0_11] : memref<8x128xf32, #tpu.memory_space<vmem>>, vector<8x128xf32>
      tpu.vector_store %arg6[%c0_10, %c0_11], %11 {strides = array<i32>} : memref<8x128xf32, #tpu.memory_space<vmem>>, vector<8x128xf32>,
    } else {
    }
    %c0 = arith.constant 0 : index
    %c0_1 = arith.constant 0 : index
    %3 = vector.load %arg6[%c0, %c0_1] : memref<8x128xf32, #tpu.memory_space<vmem>>, vector<8x128xf32>
    %c0_2 = arith.constant 0 : index
    %c0_3 = arith.constant 0 : index
    %4 = vector.load %arg3[%c0_2, %c0_3] : memref<8x128xf32, #tpu.memory_space<vmem>>, vector<8x128xf32>
    %c0_4 = arith.constant 0 : index
    %c0_5 = arith.constant 0 : index
    %5 = vector.load %arg4[%c0_4, %c0_5] : memref<128x128xf32, #tpu.memory_space<vmem>>, vector<128x128xf32>
    %cst = arith.constant dense<0.000000e+00> : vector<8x128xf32>
    %6 = tpu.matmul %4, %5, %cst {dimension_numbers = #tpu.dot_dimension_numbers<[1], [0], [0], [1], [0, 0, 1, 1], [], []>} : vector<8x128xf32>, vector<128x128xf32>, vector<8x128xf32> -> vector<8x128xf32>
    %7 = arith.addf %3, %6 : vector<8x128xf32>
    %c0_6 = arith.constant 0 : index
    %c0_7 = arith.constant 0 : index
    %8 = vector.load %arg6[%c0_6, %c0_7] : memref<8x128xf32, #tpu.memory_space<vmem>>, vector<8x128xf32>
    tpu.vector_store %arg6[%c0_6, %c0_7], %7 {strides = array<i32>} : memref<8x128xf32, #tpu.memory_space<vmem>>, vector<8x128xf32>,
    return
  }
  func.func @transform_0(%arg0: i32, %arg1: i32, %arg2: i32) -> (i32, i32) {
    %c0_i32 = arith.constant 0 : i32
    return %arg0, %arg2 : i32, i32
  }
  func.func @transform_1(%arg0: i32, %arg1: i32, %arg2: i32) -> (i32, i32) {
    %c0_i32 = arith.constant 0 : i32
    return %arg2, %arg1 : i32, i32
  }
  func.func @transform_2(%arg0: i32, %arg1: i32, %arg2: i32) -> (i32, i32) {
    %c0_i32 = arith.constant 0 : i32
    %c0_i32_0 = arith.constant 0 : i32
    return %c0_i32, %arg1 : i32, i32
  }
  func.func @transform_3(%arg0: i32, %arg1: i32, %arg2: i32) -> (i32, i32) {
    %c0_i32 = arith.constant 0 : i32
    return %arg0, %arg1 : i32, i32
  }
}

</mosaic_0001>

<bundles_post_ra>
// kernel: linear.1
= control target key start
LH: loop header
LB: loop body
LE: loop exit
PB: predicated region body
PF: predicated region fallthrough
CT: control target
= control target key end

     0   :  { %8 = vsyncpa [#allocation3], 0  ;;  %s287_s0 = inlined_call_operand.vmem [shape: f32[8,128], index: 0, kind: input, shape index: {}]   ;;  %s288_s1 = inlined_call_operand.hbm [shape: f32[128,128], index: 1, kind: input, shape index: {}]   ;;  %s289_s2 = inlined_call_operand.vmem [shape: f32[1,128], index: 2, kind: input, shape index: {}]   ;;  %s290_s3 = inlined_call_operand.hbm [shape: f32[8,32], index: 3, kind: output, shape index: {}]  }
   0x1   :  { %9 = vsyncpa [#allocation4], 0  ;;  %s249_s12 = smov [#allocation2]  }
   0x2   :  { %s17_s13 = sshll.u32 %s249_s12, 4  ;;  %s18_s13 = int_to_ptr.vmem [resolvable:$true] %s17_s13 }
   0x3   :  { %s213_s14 = scalar_lea.vmem %s18_s13, 2048  ;;  %p218_p1 = scmp.lt.s32.totalorder %s18_s13, %s18_s13 }
   0x4   :  { %p214_p0 = scmp.ne.s32.totalorder %s18_s13, %s213_s14  ;;  %p219_p2 = scmp.lt.s32.totalorder %s213_s14, %s213_s14 }
   0x6   :  { %p220_p3 = por %p219_p2, %p218_p1 }
   0x8   :  { %p221_p4 = pnand %p220_p3, %p214_p0 }
   0xa   :  { %224 = shalt.err (!%p221_p4)
}
   0xb   :  { %s250_s15 = smov 128   ;;  %s251_s16 = smov 8  }
   0xc   :  { %23 = dma.hbm_to_vmem [thread:$0]  %s288_s1, 2048, %s18_s13, [#allocation3], %s250_s15, %s250_s15, %s251_s16  }
   0xd   :  { %245 = dma.done.wait [#allocation3], 2048  }
   0xe   :  { %246 = vsyncadd [#allocation3], 4294965248  ;;  %v252_v0 = vmov 0.0   ;;  %vm253_vm0 = vmmov 0   ;;  %v58_v1 = vld [vmem:[#allocation2 + $0x78] sm:$0xff]  ;;  %v57_v2 = vld [vmem:[#allocation2 + $0x70] sm:$0xff] }
   0xf   :  { %164 = vmatprep.subr.mxu0 %v252_v0  ;;  %196 = vmatprep.mubr.msk.f32.mxu0 %vm253_vm0, %v252_v0  ;;  %v56_v3 = vld [vmem:[#allocation2 + $0x68] sm:$0xff]  ;;  %v55_v4 = vld [vmem:[#allocation2 + $0x60] sm:$0xff]  ;;  %v54_v5 = vld [vmem:[#allocation2 + $0x58] sm:$0xff]  ;;  %s254_s22 = smov [#allocation5]  }
  0x10   :  { %165 = vmatpush3.msra.mxu0 %v58_v1  ;;  %v53_v6 = vld [vmem:[#allocation2 + $0x50] sm:$0xff]  ;;  %v52_v7 = vld [vmem:[#allocation2 + $0x48] sm:$0xff]  ;;  %v51_v8 = vld [vmem:[#allocation2 + $0x40] sm:$0xff]  ;;  %s137_s23 = sshll.u32 %s254_s22, 4  ;;  %s138_s23 = int_to_ptr.vmem [resolvable:$true] %s137_s23 }
  0x11   :  { %166 = vmatprep.subr.mxu0 %v252_v0  ;;  %v50_v9 = vld [vmem:[#allocation2 + $0x38] sm:$0xff]  ;;  %v49_v10 = vld [vmem:[#allocation2 + $0x30] sm:$0xff]  ;;  %v48_v11 = vld [vmem:[#allocation2 + $0x28] sm:$0xff]  ;;  %s225_s24 = scalar_lea.vmem %s138_s23, 128  ;;  %p230_p6 = scmp.lt.s32.totalorder %s138_s23, %s138_s23 }
  0x12   :  { %167 = vmatpush3.msra.mxu0 %v57_v2  ;;  %v47_v12 = vld [vmem:[#allocation2 + $0x20] sm:$0xff]  ;;  %v46_v13 = vld [vmem:[#allocation2 + $0x18] sm:$0xff]  ;;  %v45_v14 = vld [vmem:[#allocation2 + $0x10] sm:$0xff]  ;;  %p226_p5 = scmp.ne.s32.totalorder %s138_s23, %s225_s24  ;;  %p231_p7 = scmp.lt.s32.totalorder %s225_s24, %s225_s24 }
  0x13   :  { %168 = vmatprep.subr.mxu0 %v252_v0  ;;  %v44_v15 = vld [vmem:[#allocation2 + $0x8] sm:$0xff]  ;;  %v43_v16 = vld [vmem:[#allocation2] sm:$0xff] }
  0x14   :  { %169 = vmatpush3.msra.mxu0 %v56_v3  ;;  %v42_v17 = vld [vmem:[%s287_s0] sm:$0xff]  ;;  %p232_p8 = por %p231_p7, %p230_p6 }
  0x15   :  { %170 = vmatprep.subr.mxu0 %v252_v0  ;;  %v146_v18 = vld [vmem:[%s289_s2] ss:$0 sm:$0xff] }
  0x16   :  { %171 = vmatpush3.msra.mxu0 %v55_v4  ;;  %p233_p9 = pnand %p232_p8, %p226_p5 }
  0x17   :  { %172 = vmatprep.subr.mxu0 %v252_v0 }
  0x18   :  { %173 = vmatpush3.msra.mxu0 %v54_v5 }
  0x19   :  { %174 = vmatprep.subr.mxu0 %v252_v0 }
  0x1a   :  { %175 = vmatpush3.msra.mxu0 %v53_v6 }
  0x1b   :  { %176 = vmatprep.subr.mxu0 %v252_v0 }
  0x1c   :  { %177 = vmatpush3.msra.mxu0 %v52_v7 }
  0x1d   :  { %178 = vmatprep.subr.mxu0 %v252_v0 }
  0x1e   :  { %179 = vmatpush3.msra.mxu0 %v51_v8 }
  0x1f   :  { %180 = vmatprep.subr.mxu0 %v252_v0 }
  0x20   :  { %181 = vmatpush3.msra.mxu0 %v50_v9 }
  0x21   :  { %182 = vmatprep.subr.mxu0 %v252_v0 }
  0x22   :  { %183 = vmatpush3.msra.mxu0 %v49_v10 }
  0x23   :  { %184 = vmatprep.subr.mxu0 %v252_v0 }
  0x24   :  { %185 = vmatpush3.msra.mxu0 %v48_v11 }
  0x25   :  { %186 = vmatprep.subr.mxu0 %v252_v0 }
  0x26   :  { %187 = vmatpush3.msra.mxu0 %v47_v12 }
  0x27   :  { %188 = vmatprep.subr.mxu0 %v252_v0 }
  0x28   :  { %189 = vmatpush3.msra.mxu0 %v46_v13 }
  0x29   :  { %190 = vmatprep.subr.mxu0 %v252_v0 }
  0x2a   :  { %191 = vmatpush3.msra.mxu0 %v45_v14 }
  0x2b   :  { %192 = vmatprep.subr.mxu0 %v252_v0 }
  0x2c   :  { %193 = vmatpush3.msra.mxu0 %v44_v15 }
  0x2d   :  { %194 = vmatprep.subr.mxu0 %v252_v0 }
  0x2e   :  { %195 = vmatpush3.msra.mxu0 %v43_v16 }
  0x2f   :  { %197 = vmatmul.mubr.f32.vlgmr.msra.gmra.mxu0 %v42_v17 }
  0xef   :  { %v125_v19 = vpop.f32.mrf.mxu0 }
  0xf0   :  { %v129_v20 = vadd.f32 %v146_v18, %v125_v19 }
  0xf1   :  { %v198_v21 = vpop.f32.mrf.mxu0 }
  0xf2   :  { %130 = vst [vmem:[#allocation5] sm:$0xff] %v129_v20 }
  0xf3   :  { %236 = shalt.err (!%p233_p9)
}
  0xf4   :  { %140 = dma.vmem_to_hbm [thread:$0]  %s138_s23, 128, %s290_s3, [#allocation4]  }
  0xf5   :  { %247 = dma.done.wait [#allocation4], 128  }
  0xf6   :  { %248 = vsyncadd [#allocation4], 4294967168 }
  0xf7   :  { %144 = vsyncpa [#allocation3], 1 }
  0xf8   :  { %145 = vsyncpa [#allocation4], 1 }

</bundles_post_ra>
